<compile_context>
chip_gen: v7x
topology: tpu7x:2x2x1
jax: 0.10.0
libtpu: 0.0.40
codegen_flags: <defaults>
</compile_context>

<pallas_src>
import functools
import math

import jax
import jax.numpy as jnp
from jax.experimental import pallas as pl
from jax.experimental.pallas import tpu as pltpu

_INV_SQRT_2PI = 1.0 / math.sqrt(2.0 * math.pi)


# --------------------------------------------------------------------------
# Fused linear kernel: y = x @ Wt + b, split along out_f into several outputs
# (used for the fused q/k/v/sigma projection and for the out_projection).
# --------------------------------------------------------------------------
def _fused_linear_kernel(*refs, widths):
    x_ref, wt_ref, b_ref = refs[:3]
    out_refs = refs[3:]
    # bf16 MXU operands, f32 accumulation; bias added in f32.
    y = jnp.dot(
        x_ref[...].astype(jnp.bfloat16), wt_ref[...],
        preferred_element_type=jnp.float32,
    ) + b_ref[...]
    off = 0
    for w, o_ref in zip(widths, out_refs):
        o_ref[...] = y[:, off:off + w]
        off += w


def _pick_row_tile(n, max_rows=512):
    """Largest row tile <= max_rows that divides n (or n itself if small)."""
    if n <= max_rows:
        return n
    for t in (512, 256, 128, 64, 32, 16, 8):
        if t <= max_rows and n % t == 0:
            return t
    return n


def _fused_linear(x2d, wt_bf16, b_f32, widths):
    """x2d: (N, in_f) f32; wt_bf16: (in_f, sum(widths)); b_f32: (1, sum(widths)).

    Returns a tuple of f32 arrays (N, w) for w in widths."""
    n, in_f = x2d.shape
    ftot = int(sum(widths))
    tm = _pick_row_tile(n)
    grid = (n // tm,)
    out_shape = tuple(jax.ShapeDtypeStruct((n, w), jnp.float32) for w in widths)
    out_specs = tuple(pl.BlockSpec((tm, w), lambda i: (i, 0)) for w in widths)
    return pl.pallas_call(
        functools.partial(_fused_linear_kernel, widths=tuple(widths)),
        grid=grid,
        out_shape=out_shape,
        in_specs=[
            pl.BlockSpec((tm, in_f), lambda i: (i, 0)),
            pl.BlockSpec((in_f, ftot), lambda i: (0, 0)),   # revisited weight
            pl.BlockSpec((1, ftot), lambda i: (0, 0)),      # revisited bias
        ],
        out_specs=out_specs,
        compiler_params=pltpu.CompilerParams(
            dimension_semantics=("parallel",)),
    )(x2d, wt_bf16, b_f32)


# --------------------------------------------------------------------------
# Anomaly attention kernel: one batch element (all H heads) per grid step.
# Inputs keep the projection layout (L, H*dk) — heads are lane slices.
# --------------------------------------------------------------------------
def _anomaly_attn_kernel(q_ref, k_ref, v_ref, sig_ref, nd2_ref,
                         out_ref, series_ref, prior_ref, *, H, dk, dv, scale):
    q = q_ref[0]            # (L, H*dk) f32
    k = k_ref[0]            # (S, H*dk) f32
    v = v_ref[0]            # (S, H*dv) f32
    sig = sig_ref[0]        # (L, H)    f32
    nd2 = nd2_ref[...]      # (L, S)    = -0.5 * |i - j|^2  (shared, constant)

    # Fold the 1/sqrt(E) scale into q once; bf16 operands for the MXU.
    q_bf = (q * scale).astype(jnp.bfloat16)
    k_bf = k.astype(jnp.bfloat16)
    v_bf = v.astype(jnp.bfloat16)

    outs = []
    for h in range(H):                                     # static unroll
        q_h = q_bf[:, h * dk:(h + 1) * dk]                 # (L, dk)
        k_h = k_bf[:, h * dk:(h + 1) * dk]                 # (S, dk)
        v_h = v_bf[:, h * dv:(h + 1) * dv]                 # (S, dv)

        # scores[l, s] = sum_e q[l, e] * k[s, e]   (f32 accumulation)
        scores = jax.lax.dot_general(
            q_h, k_h,
            dimension_numbers=(((1,), (1,)), ((), ())),
            preferred_element_type=jnp.float32)            # (L, S)

        # softmax over the key axis -> series (row-wise reciprocal, exact)
        m = jnp.max(scores, axis=-1, keepdims=True)
        e = jnp.exp(scores - m)
        inv_den = pl.reciprocal(jnp.sum(e, axis=-1, keepdims=True),
                                approx=False)              # (L, 1)
        series_h = e * inv_den                             # (L, S)

        # sigma transform (per query position) and un-normalized Gaussian prior
        s_h = sig[:, h:h + 1]                              # (L, 1)
        s_h = jnp.power(3.0, jax.nn.sigmoid(5.0 * s_h) + 1e-5) - 1.0
        inv_s = pl.reciprocal(s_h, approx=True)            # (L, 1)  EUP
        coef = inv_s * _INV_SQRT_2PI                       # 1/(sqrt(2pi)*sigma)
        inv_s2 = inv_s * inv_s                             # 1/sigma^2
        prior_h = coef * jnp.exp(nd2 * inv_s2)             # (L, S)

        out_h = jnp.dot(series_h.astype(jnp.bfloat16), v_h,
                        preferred_element_type=jnp.float32)  # (L, dv)

        series_ref[0, h, :, :] = series_h
        prior_ref[0, h, :, :] = prior_h
        outs.append(out_h)

    # Single lane-dense store in (L, H*dv) layout (ready for out_projection).
    out_ref[0] = jnp.concatenate(outs, axis=-1)


def _anomaly_attention(qb, kb, vb, sigb, nd2, H, dk, dv):
    """qb: (B, L, H*dk); kb: (B, S, H*dk); vb: (B, S, H*dv); sigb: (B, L, H);
    nd2: (L, S).  Returns out (B, L, H*dv), series (B, H, L, S), prior (...)."""
    B, L, _ = qb.shape
    S = kb.shape[1]
    # TODO(synk): for long sequences (L,S >= ~1024) tile the key axis S inside
    # the kernel (online softmax) and set vmem_limit_bytes for v7x's 64 MiB VMEM.
    return pl.pallas_call(
        functools.partial(_anomaly_attn_kernel, H=H, dk=dk, dv=dv,
                          scale=1.0 / math.sqrt(dk)),
        grid=(B,),
        out_shape=(
            jax.ShapeDtypeStruct((B, L, H * dv), jnp.float32),
            jax.ShapeDtypeStruct((B, H, L, S), jnp.float32),
            jax.ShapeDtypeStruct((B, H, L, S), jnp.float32),
        ),
        in_specs=[
            pl.BlockSpec((1, L, H * dk), lambda b: (b, 0, 0)),
            pl.BlockSpec((1, S, H * dk), lambda b: (b, 0, 0)),
            pl.BlockSpec((1, S, H * dv), lambda b: (b, 0, 0)),
            pl.BlockSpec((1, L, H), lambda b: (b, 0, 0)),
            pl.BlockSpec((L, S), lambda b: (0, 0)),         # revisited constant
        ],
        out_specs=(
            pl.BlockSpec((1, L, H * dv), lambda b: (b, 0, 0)),
            pl.BlockSpec((1, H, L, S), lambda b: (b, 0, 0, 0)),
            pl.BlockSpec((1, H, L, S), lambda b: (b, 0, 0, 0)),
        ),
        compiler_params=pltpu.CompilerParams(
            dimension_semantics=("parallel",)),
    )(qb, kb, vb, sigb, nd2)


# --------------------------------------------------------------------------
# AttentionLayer parameters (pre-transposed / fused weights) and forward pass
# --------------------------------------------------------------------------
def init_attention_layer_params(key, d_model, n_heads, d_keys=None, d_values=None):
    d_keys = d_keys or d_model // n_heads
    d_values = d_values or d_model // n_heads

    def linear_init(k, out_f, in_f):
        kw, kb = jax.random.split(k)
        bound = 1.0 / math.sqrt(in_f)
        w = jax.random.uniform(kw, (out_f, in_f), jnp.float32, -bound, bound)
        b = jax.random.uniform(kb, (out_f,), jnp.float32, -bound, bound)
        return w, b

    ks = jax.random.split(key, 5)
    wq, bq = linear_init(ks[0], d_keys * n_heads, d_model)
    wk, bk = linear_init(ks[1], d_keys * n_heads, d_model)
    wv, bv = linear_init(ks[2], d_values * n_heads, d_model)
    ws, bs = linear_init(ks[3], n_heads, d_model)
    wo, bo = linear_init(ks[4], d_model, d_values * n_heads)

    bf = jnp.bfloat16
    return dict(
        n_heads=n_heads, d_keys=d_keys, d_values=d_values, d_model=d_model,
        # fully fused q/k/v/sigma projection (self-attention fast path)
        wt_qkvs=jnp.concatenate([wq.T, wk.T, wv.T, ws.T], axis=1).astype(bf),
        b_qkvs=jnp.concatenate([bq, bk, bv, bs]).reshape(1, -1),
        # general (cross-attention) path: q+sigma fused on queries; k / v alone
        wt_qs=jnp.concatenate([wq.T, ws.T], axis=1).astype(bf),
        b_qs=jnp.concatenate([bq, bs]).reshape(1, -1),
        wt_k=wk.T.astype(bf), b_k=bk.reshape(1, -1),
        wt_v=wv.T.astype(bf), b_v=bv.reshape(1, -1),
        # output projection
        wt_o=wo.T.astype(bf), b_o=bo.reshape(1, -1),
    )


def attention_layer_forward(params, queries, keys, values, attn_mask=None):
    B, L, d_model = queries.shape
    _, S, _ = keys.shape
    H = params["n_heads"]
    dk = params["d_keys"]
    dv = params["d_values"]
    Wq, Wv = H * dk, H * dv

    xq = queries.reshape(B * L, d_model)
    if (keys is queries) and (values is queries):
        # Self-attention (as used by the Anomaly Transformer): one fused matmul
        # for all four projections -> single read of the activations.
        q2d, k2d, v2d, sig2d = _fused_linear(
            xq, params["wt_qkvs"], params["b_qkvs"], (Wq, Wq, Wv, H))
    else:
        # General cross-attention path (still fuses q + sigma on queries).
        q2d, sig2d = _fused_linear(xq, params["wt_qs"], params["b_qs"], (Wq, H))
        (k2d,) = _fused_linear(keys.reshape(B * S, d_model),
                               params["wt_k"], params["b_k"], (Wq,))
        (v2d,) = _fused_linear(values.reshape(B * S, d_model),
                               params["wt_v"], params["b_v"], (Wv,))

    # Free (metadata-only) reshapes: heads are split inside the attention kernel.
    qb = q2d.reshape(B, L, Wq)
    kb = k2d.reshape(B, S, Wq)
    vb = v2d.reshape(B, S, Wv)
    sigb = sig2d.reshape(B, L, H)

    # -0.5 * |i - j|^2 distance kernel, shared across all batches and heads.
    ri = jnp.arange(L, dtype=jnp.float32)[:, None]
    ci = jnp.arange(S, dtype=jnp.float32)[None, :]
    nd2 = -0.5 * (ri - ci) ** 2

    out_b, series, prior = _anomaly_attention(qb, kb, vb, sigb, nd2, H, dk, dv)

    (out2d,) = _fused_linear(out_b.reshape(B * L, Wv),
                             params["wt_o"], params["b_o"], (d_model,))
    out = out2d.reshape(B, L, d_model)

    # sigma returned broadcast to (B, H, L, S) to match the official
    # AnomalyAttention output (broadcast done outside the kernel; the kernel
    # itself never materializes this rank-1 slab).
    sig_rows = jnp.power(3.0, jax.nn.sigmoid(5.0 * sigb) + 1e-5) - 1.0  # (B,L,H)
    sigma = jnp.broadcast_to(
        jnp.transpose(sig_rows, (0, 2, 1))[..., None], (B, H, L, S))

    return out, series, prior, sigma


if __name__ == "__main__":
    B, L, d_model, n_heads = 2, 8, 32, 4

    key = jax.random.PRNGKey(0)
    k_param, k_x = jax.random.split(key)
    params = init_attention_layer_params(k_param, d_model, n_heads)

    x = jax.random.normal(k_x, (B, L, d_model), dtype=jnp.float32)
    queries = keys = values = x

    out, series, prior, sigma = attention_layer_forward(
        params, queries, keys, values, None)
    jax.block_until_ready((out, series, prior, sigma))

    assert out.shape == (B, L, d_model)
    assert series.shape == (B, n_heads, L, L)
    assert prior.shape == (B, n_heads, L, L)
    assert sigma.shape == (B, n_heads, L, L)
    assert bool(jnp.isfinite(out).all())
    assert bool(jnp.isfinite(series).all())
    assert bool(jnp.isfinite(prior).all())
    assert bool(jnp.isfinite(sigma).all())
    print("KERNEL_OK")
</pallas_src>

<mosaic_0001>
module attributes {stable_mosaic.version = 11 : i64} {
  func.func @_fused_linear_kernel(%arg0: i32, %arg1: memref<16x32xf32, #tpu.memory_space<vmem>>, %arg2: memref<32x100xbf16, #tpu.memory_space<vmem>>, %arg3: memref<1x100xf32, #tpu.memory_space<vmem>>, %arg4: memref<16x32xf32, #tpu.memory_space<vmem>>, %arg5: memref<16x32xf32, #tpu.memory_space<vmem>>, %arg6: memref<16x32xf32, #tpu.memory_space<vmem>>, %arg7: memref<16x4xf32, #tpu.memory_space<vmem>>) attributes {dimension_semantics = [#tpu.dimension_semantics<parallel>], iteration_bounds = array<i64: 1>, scalar_prefetch = 0 : i64, scratch_operands = 0 : i64, tpu.core_type = #tpu.core_type<tc>, window_params = [{transform_indices = @transform_0, window_bounds = array<i64: 16, 32>}, {pipeline_mode = #tpu.pipeline_mode<synchronous>, transform_indices = @transform_1, window_bounds = array<i64: 32, 100>}, {pipeline_mode = #tpu.pipeline_mode<synchronous>, transform_indices = @transform_2, window_bounds = array<i64: 1, 100>}, {transform_indices = @transform_3, window_bounds = array<i64: 16, 32>}, {transform_indices = @transform_4, window_bounds = array<i64: 16, 32>}, {transform_indices = @transform_5, window_bounds = array<i64: 16, 32>}, {transform_indices = @transform_6, window_bounds = array<i64: 16, 4>}]} {
    %c0 = arith.constant 0 : index
    %c0_0 = arith.constant 0 : index
    %0 = vector.load %arg1[%c0, %c0_0] : memref<16x32xf32, #tpu.memory_space<vmem>>, vector<16x32xf32>
    %1 = arith.truncf %0 : vector<16x32xf32> to vector<16x32xbf16>
    %c0_1 = arith.constant 0 : index
    %c0_2 = arith.constant 0 : index
    %2 = vector.load %arg2[%c0_1, %c0_2] : memref<32x100xbf16, #tpu.memory_space<vmem>>, vector<32x100xbf16>
    %cst = arith.constant dense<0.000000e+00> : vector<16x100xf32>
    %3 = tpu.matmul %1, %2, %cst {dimension_numbers = #tpu.dot_dimension_numbers<[1], [0], [0], [1], [0, 0, 1, 1], [], []>} : vector<16x32xbf16>, vector<32x100xbf16>, vector<16x100xf32> -> vector<16x100xf32>
    %c0_3 = arith.constant 0 : index
    %c0_4 = arith.constant 0 : index
    %4 = vector.load %arg3[%c0_3, %c0_4] : memref<1x100xf32, #tpu.memory_space<vmem>>, vector<1x100xf32>
    %5 = vector.broadcast %4 : vector<1x100xf32> to vector<16x100xf32>
    %6 = arith.addf %3, %5 : vector<16x100xf32>
    %7 = vector.extract_strided_slice %6 {offsets = [0, 0], sizes = [16, 32], strides = [1, 1]} : vector<16x100xf32> to vector<16x32xf32>
    %c0_5 = arith.constant 0 : index
    %c0_6 = arith.constant 0 : index
    %8 = vector.load %arg4[%c0_5, %c0_6] : memref<16x32xf32, #tpu.memory_space<vmem>>, vector<16x32xf32>
    tpu.vector_store %arg4[%c0_5, %c0_6], %7 {strides = array<i32>} : memref<16x32xf32, #tpu.memory_space<vmem>>, vector<16x32xf32>,
    %9 = vector.extract_strided_slice %6 {offsets = [0, 32], sizes = [16, 32], strides = [1, 1]} : vector<16x100xf32> to vector<16x32xf32>
    %c0_7 = arith.constant 0 : index
    %c0_8 = arith.constant 0 : index
    %10 = vector.load %arg5[%c0_7, %c0_8] : memref<16x32xf32, #tpu.memory_space<vmem>>, vector<16x32xf32>
    tpu.vector_store %arg5[%c0_7, %c0_8], %9 {strides = array<i32>} : memref<16x32xf32, #tpu.memory_space<vmem>>, vector<16x32xf32>,
    %11 = vector.extract_strided_slice %6 {offsets = [0, 64], sizes = [16, 32], strides = [1, 1]} : vector<16x100xf32> to vector<16x32xf32>
    %c0_9 = arith.constant 0 : index
    %c0_10 = arith.constant 0 : index
    %12 = vector.load %arg6[%c0_9, %c0_10] : memref<16x32xf32, #tpu.memory_space<vmem>>, vector<16x32xf32>
    tpu.vector_store %arg6[%c0_9, %c0_10], %11 {strides = array<i32>} : memref<16x32xf32, #tpu.memory_space<vmem>>, vector<16x32xf32>,
    %13 = vector.extract_strided_slice %6 {offsets = [0, 96], sizes = [16, 4], strides = [1, 1]} : vector<16x100xf32> to vector<16x4xf32>
    %c0_11 = arith.constant 0 : index
    %c0_12 = arith.constant 0 : index
    %14 = vector.load %arg7[%c0_11, %c0_12] : memref<16x4xf32, #tpu.memory_space<vmem>>, vector<16x4xf32>
    tpu.vector_store %arg7[%c0_11, %c0_12], %13 {strides = array<i32>} : memref<16x4xf32, #tpu.memory_space<vmem>>, vector<16x4xf32>,
    return
  }
  func.func @transform_0(%arg0: i32) -> (i32, i32) {
    %c0_i32 = arith.constant 0 : i32
    %c0_i32_0 = arith.constant 0 : i32
    return %arg0, %c0_i32 : i32, i32
  }
  func.func @transform_1(%arg0: i32) -> (i32, i32) {
    %c0_i32 = arith.constant 0 : i32
    %c0_i32_0 = arith.constant 0 : i32
    %c0_i32_1 = arith.constant 0 : i32
    return %c0_i32, %c0_i32_0 : i32, i32
  }
  func.func @transform_2(%arg0: i32) -> (i32, i32) {
    %c0_i32 = arith.constant 0 : i32
    %c0_i32_0 = arith.constant 0 : i32
    %c0_i32_1 = arith.constant 0 : i32
    return %c0_i32, %c0_i32_0 : i32, i32
  }
  func.func @transform_3(%arg0: i32) -> (i32, i32) {
    %c0_i32 = arith.constant 0 : i32
    %c0_i32_0 = arith.constant 0 : i32
    return %arg0, %c0_i32 : i32, i32
  }
  func.func @transform_4(%arg0: i32) -> (i32, i32) {
    %c0_i32 = arith.constant 0 : i32
    %c0_i32_0 = arith.constant 0 : i32
    return %arg0, %c0_i32 : i32, i32
  }
  func.func @transform_5(%arg0: i32) -> (i32, i32) {
    %c0_i32 = arith.constant 0 : i32
    %c0_i32_0 = arith.constant 0 : i32
    return %arg0, %c0_i32 : i32, i32
  }
  func.func @transform_6(%arg0: i32) -> (i32, i32) {
    %c0_i32 = arith.constant 0 : i32
    %c0_i32_0 = arith.constant 0 : i32
    return %arg0, %c0_i32 : i32, i32
  }
}

</mosaic_0001>

<bundles_post_ra>
// kernel: tpu_custom_call.1
= control target key start
LH: loop header
LB: loop body
LE: loop exit
PB: predicated region body
PF: predicated region fallthrough
CT: control target
= control target key end

     0   :  { %12 = vsyncpa [#allocation3], 0  ;;  %s499_s0 = inlined_call_operand.hbm [shape: f32[16,32], index: 0, kind: input, shape index: {}]   ;;  %s500_s1 = inlined_call_operand.hbm [shape: bf16[32,100], index: 1, kind: input, shape index: {}]   ;;  %s501_s2 = inlined_call_operand.vmem [shape: f32[1,100], index: 2, kind: input, shape index: {}]   ;;  %s502_s3 = inlined_call_operand.hbm [shape: f32[16,32], index: 3, kind: output, shape index: {0}]   ;;  %s503_s4 = inlined_call_operand.hbm [shape: f32[16,32], index: 4, kind: output, shape index: {1}]   ;;  %s504_s5 = inlined_call_operand.hbm [shape: f32[16,32], index: 5, kind: output, shape index: {2}]   ;;  %s505_s6 = inlined_call_operand.vmem [shape: f32[16,4], index: 6, kind: output, shape index: {3}]  }
   0x1   :  { %13 = vsyncpa [#allocation6], 0 }
   0x2   :  { %14 = vsyncpa [#allocation4], 0 }
   0x3   :  { %15 = vsyncpa [#allocation9], 0  ;;  %s350_s21 = smov [#allocation2]   ;;  %s232_s25 = scalar_lea.hbm %s499_s0, 256 }
   0x4   :  { %s21_s22 = sshll.u32 %s350_s21, 4  ;;  %p233_p0 = scmp.ne.s32.totalorder %s499_s0, %s232_s25  ;;  %s22_s22 = int_to_ptr.vmem [resolvable:$true] %s21_s22 }
   0x5   :  { %p236_p1 = scmp.lt.u32.totalorder %s232_s25, %s499_s0 }
   0x7   :  { %p238_p2 = pnand %p236_p1, %p233_p0 }
   0x9   :  { %241 = shalt.err (!%p238_p2)
}
   0xa   :  { %s242_s30 = scalar_lea.vmem %s22_s22, 256  ;;  %p247_p4 = scmp.lt.s32.totalorder %s22_s22, %s22_s22 }
   0xb   :  { %p243_p3 = scmp.ne.s32.totalorder %s22_s22, %s242_s30  ;;  %p248_p5 = scmp.lt.s32.totalorder %s242_s30, %s242_s30 }
   0xd   :  { %p249_p6 = por %p248_p5, %p247_p4 }
   0xf   :  { %p250_p7 = pnand %p249_p6, %p243_p3 }
  0x11   :  { %253 = shalt.err (!%p250_p7)
}
  0x12   :  { %s351_s7 = smov 128   ;;  %s352_s8 = smov 8  }
  0x13   :  { %27 = dma.hbm_to_vmem [thread:$0]  %s499_s0, 256, %s22_s22, [#allocation3], %s351_s7, %s351_s7, %s352_s8  }
  0x14   :  { %s353_s11 = smov [#allocation5]   ;;  %s254_s15 = scalar_lea.hbm %s500_s1, 256 }
  0x15   :  { %s33_s12 = sshll.u32 %s353_s11, 4  ;;  %p255_p8 = scmp.ne.s32.totalorder %s500_s1, %s254_s15  ;;  %s34_s12 = int_to_ptr.vmem [resolvable:$true] %s33_s12 }
  0x16   :  { %p258_p9 = scmp.lt.u32.totalorder %s254_s15, %s500_s1 }
  0x18   :  { %p260_p10 = pnand %p258_p9, %p255_p8 }
  0x1a   :  { %263 = shalt.err (!%p260_p10)
}
  0x1b   :  { %s264_s20 = scalar_lea.vmem %s34_s12, 256  ;;  %p269_p12 = scmp.lt.s32.totalorder %s34_s12, %s34_s12 }
  0x1c   :  { %p265_p11 = scmp.ne.s32.totalorder %s34_s12, %s264_s20  ;;  %p270_p13 = scmp.lt.s32.totalorder %s264_s20, %s264_s20 }
  0x1e   :  { %p271_p0 = por %p270_p13, %p269_p12 }
  0x20   :  { %p272_p1 = pnand %p271_p0, %p265_p11 }
  0x22   :  { %275 = shalt.err (!%p272_p1)
}
  0x23   :  { %s354_s0 = smov 64   ;;  %s355_s21 = smov 4  }
  0x24   :  { %39 = dma.hbm_to_vmem [thread:$0]  %s500_s1, 256, %s34_s12, [#allocation6], %s354_s0, %s354_s0, %s355_s21  }
  0x25   :  { %342 = dma.done.wait [#allocation3], 256  }
  0x26   :  { %343 = vsyncadd [#allocation3], 4294967040 }
  0x27   :  { %344 = dma.done.wait [#allocation6], 256  }
  0x28   :  { %345 = vsyncadd [#allocation6], 4294967040  ;;  %v356_v0 = vmov 0.0   ;;  %vm357_vm0 = vmmov 0   ;;  %v230_v1 = vld [vmem:[#allocation5] sm:$0xff]   ;;  %v231_v2 = vld [vmem:[#allocation5 + $0x8] sm:$0xff]  }
  0x29   :  { %209 = vmatprep.subr.bf16.mxu0 %v356_v0  ;;  %213 = vmatprep.mubr.msk.bf16.mxu0 %vm357_vm0, %v356_v0  ;;  %v49_v3 = vld [vmem:[#allocation2] sm:$0xff]  ;;  %v50_v4 = vld [vmem:[#allocation2 + $0x8] sm:$0xff]  ;;  %vm75_vm1 = vcmask 261120   ;;  %v202_v6 = vld [vmem:[%s501_s2] ss:$0 sm:$0xff]  ;;  %s358_s25 = smov [#allocation7]  }
  0x2a   :  { %210 = vmatpush3.bf16.msra.mxu0 %v230_v1  ;;  %v51_v5 = vpack.c.bf16 %v50_v4, %v49_v3  ;;  %s154_s26 = sshll.u32 %s358_s25, 4  ;;  %s359_s27 = smov 96   ;;  %s155_s26 = int_to_ptr.vmem [resolvable:$true] %s154_s26 }
  0x2b   :  { %211 = vmatprep.subr.bf16.mxu0 %v356_v0  ;;  %s276_s28 = scalar_lea.vmem %s155_s26, 256  ;;  %p281_p3 = scmp.lt.s32.totalorder %s155_s26, %s155_s26 }
  0x2c   :  { %p277_p2 = scmp.ne.s32.totalorder %s155_s26, %s276_s28  ;;  %p282_p4 = scmp.lt.s32.totalorder %s276_s28, %s276_s28 }
  0x2e   :  { %212 = vmatpush3.bf16.msra.mxu0 %v231_v2  ;;  %p283_p5 = por %p282_p4, %p281_p3 }
  0x30   :  { %p284_p6 = pnand %p283_p5, %p277_p2 }
  0x31   :  { %214 = vmatmul.mubr.msk.bf16.vlgmr.msra.gmra.mrb[0].mxu0 %vm75_vm1, %v51_v5 }
 0x104   :  { %v113_v7 = vpop.f32.mrb[0].mxu0 }
 0x105   :  { %v114_v8 = vadd.f32 %v202_v6, %v113_v7  ;;  %v215_v9 = vpop.f32.mrb[1].mxu0 }
 0x106   :  { %v116_v10 = vpop.f32.mrb[2].mxu0 }
 0x107   :  { %120 = vst.msk [vmem:[#allocation7] sm:$0xff] %vm75_vm1, %v114_v8  ;;  %v117_v11 = vadd.f32 %v202_v6, %v116_v10  ;;  %132 = vrot.lane.b32.xlu1 %v114_v8, %s354_s0  ;;  %124 = vrot.lane.b32.xlu0 %v114_v8, %s359_s27  ;;  %v216_v12 = vpop.f32.mrb[3].mxu0 }
 0x109   :  { %121 = vst.msk [vmem:[#allocation7 + $0x8] sm:$0xff] %vm75_vm1, %v117_v11 }
 0x10a   :  { %287 = shalt.err (!%p284_p6)
}
 0x10b   :  { %s288_s30 = scalar_lea.hbm %s502_s3, 256 }
 0x10c   :  { %p289_p7 = scmp.ne.s32.totalorder %s502_s3, %s288_s30  ;;  %p292_p8 = scmp.lt.u32.totalorder %s288_s30, %s502_s3 }
 0x10e   :  { %p294_p9 = pnand %p292_p8, %p289_p7 }
 0x110   :  { %297 = shalt.err (!%p294_p9)
}
 0x111   :  { %160 = dma.vmem_to_hbm [thread:$0]  %s155_s26, 256, %s502_s3, [#allocation4], %s351_s7, %s351_s7, %s352_s8   ;;  %vm146_vm2 = vcmask 31744  }
 0x112   :  { %134 = vrot.lane.b32.xlu1 %v117_v11, %s354_s0  ;;  %126 = vrot.lane.b32.xlu0 %v117_v11, %s359_s27  ;;  %s360_s15 = smov 32   ;;  %s361_s16 = smov [#allocation8]  }
 0x113   :  { %s166_s17 = sshll.u32 %s361_s16, 4  ;;  %s362_s18 = smov [#allocation10]   ;;  %s167_s17 = int_to_ptr.vmem [resolvable:$true] %s166_s17 }
 0x114   :  { %s178_s19 = sshll.u32 %s362_s18, 4  ;;  %s298_s3 = scalar_lea.vmem %s167_s17, 256  ;;  %s452_s19 = int_to_ptr.vmem [resolvable:$true] %s178_s19 }
 0x115   :  { %p299_p10 = scmp.ne.s32.totalorder %s167_s17, %s298_s3  ;;  %p303_p11 = scmp.lt.s32.totalorder %s167_s17, %s167_s17 }
 0x116   :  { %142 = vrot.lane.b32.xlu1 %v117_v11, %s360_s15  ;;  %140 = vrot.lane.b32.xlu0 %v114_v8, %s360_s15  ;;  %p304_p12 = scmp.lt.s32.totalorder %s298_s3, %s298_s3 }
 0x118   :  { %p305_p13 = por %p304_p12, %p303_p11 }
 0x11a   :  { %p306_p0 = pnand %p305_p13, %p299_p10 }
 0x179   :  { %v133_v13 = vpop.permute.xlu1 %132  ;;  %v125_v14 = vpop.permute.xlu0 %124 }
 0x17a   :  { %138 = vst.msk [vmem:[#allocation10] sm:$0xff] %vm75_vm1, %v133_v13  ;;  %130 = vst.msk [vmem:[#allocation8] sm:$0xff] %vm75_vm1, %v125_v14 }
 0x184   :  { %v135_v15 = vpop.permute.xlu1 %134  ;;  %v127_v16 = vpop.permute.xlu0 %126 }
 0x185   :  { %139 = vst.msk [vmem:[#allocation10 + $0x8] sm:$0xff] %vm75_vm1, %v135_v15  ;;  %131 = vst.msk [vmem:[#allocation8 + $0x8] sm:$0xff] %vm75_vm1, %v127_v16 }
 0x186   :  { %309 = shalt.err (!%p306_p0)
}
 0x187   :  { %s310_s21 = scalar_lea.hbm %s503_s4, 256 }
 0x188   :  { %p311_p1 = scmp.ne.s32.totalorder %s503_s4, %s310_s21  ;;  %p314_p2 = scmp.lt.u32.totalorder %s310_s21, %s503_s4 }
 0x18a   :  { %p316_p3 = pnand %p314_p2, %p311_p1 }
 0x18c   :  { %319 = shalt.err (!%p316_p3)
}
 0x18d   :  { %172 = dma.vmem_to_hbm [thread:$0]  %s167_s17, 256, %s503_s4, [#allocation9], %s351_s7, %s351_s7, %s352_s8  }
 0x18e   :  { %s320_s27 = scalar_lea.vmem %s452_s19, 256  ;;  %p325_p5 = scmp.lt.s32.totalorder %s452_s19, %s452_s19 }
 0x18f   :  { %p321_p4 = scmp.ne.s32.totalorder %s452_s19, %s320_s27  ;;  %p326_p6 = scmp.lt.s32.totalorder %s320_s27, %s320_s27 }
 0x191   :  { %p327_p7 = por %p326_p6, %p325_p5 }
 0x193   :  { %p328_p8 = pnand %p327_p7, %p321_p4 }
 0x195   :  { %331 = shalt.err (!%p328_p8)
}
 0x196   :  { %s332_s29 = scalar_lea.hbm %s504_s5, 256 }
 0x197   :  { %p333_p9 = scmp.ne.s32.totalorder %s504_s5, %s332_s29  ;;  %p336_p10 = scmp.lt.u32.totalorder %s332_s29, %s504_s5 }
 0x199   :  { %p338_p11 = pnand %p336_p10, %p333_p9 }
 0x19b   :  { %341 = shalt.err (!%p338_p11)
}
 0x19c   :  { %184 = dma.vmem_to_hbm [thread:$0]  %s452_s19, 256, %s504_s5, [#allocation9], %s351_s7, %s351_s7, %s352_s8   ;;  %v143_v17 = vpop.permute.xlu1 %142  ;;  %v141_v18 = vpop.permute.xlu0 %140 }
 0x19d   :  { %148 = vst.msk [vmem:[%s505_s6 + $0x8] sm:$0xff] %vm146_vm2, %v143_v17  ;;  %147 = vst.msk [vmem:[%s505_s6] sm:$0xff] %vm146_vm2, %v141_v18 }
 0x19e   :  { %346 = dma.done.wait [#allocation4], 256  }
 0x19f   :  { %347 = vsyncadd [#allocation4], 4294967040 }
 0x1a0   :  { %348 = dma.done.wait [#allocation9], 512  }
 0x1a1   :  { %349 = vsyncadd [#allocation9], 4294966784 }
 0x1a2   :  { %198 = vsyncpa [#allocation3], 1 }
 0x1a3   :  { %199 = vsyncpa [#allocation6], 1 }
 0x1a4   :  { %200 = vsyncpa [#allocation4], 1 }
 0x1a5   :  { %201 = vsyncpa [#allocation9], 1 }

</bundles_post_ra>
